<compile_context>
chip_gen: v6e
topology: v6e:2x2x1
jax: 0.10.0
libtpu: 0.0.40
codegen_flags: <defaults>
</compile_context>

<pallas_src>
import numpy as np
import jax
import jax.numpy as jnp
from jax.experimental import pallas as pl
from jax.experimental.pallas import tpu as pltpu


def _round_up(x, m):
    return ((x + m - 1) // m) * m


# ----------------------------- Pallas kernel --------------------------------

def _ttlinear_kernel(x_ref, w_ref, b_ref, o_ref):
    # x_ref : (tm, IN)     bf16 activation tile (streamed / double-buffered)
    # w_ref : (IN, OUT_p)  bf16 weight already in (in, out) layout, VMEM-resident
    # b_ref : (1, OUT_p)   f32 bias row, broadcast over the batch tile
    # o_ref : (tm, OUT_p)  f32 output tile (OUT_p % 128 == 0 -> unmasked stores)
    acc = jnp.dot(x_ref[...], w_ref[...], preferred_element_type=jnp.float32)
    o_ref[...] = (acc + b_ref[...]).astype(o_ref.dtype)


def tt_linear_forward(x, w_io, bias, *, tm=128):
    """y = x @ W.T + bias, with W.T supplied as w_io of shape (IN, OUT)."""
    B, IN = x.shape
    OUT = w_io.shape[1]

    # bf16 MXU operands; accumulation is f32 inside the kernel.
    x_bf = x.astype(jnp.bfloat16)
    w_bf = w_io.astype(jnp.bfloat16)

    # Lane-dense output: pad OUT up to a multiple of 128.
    OUT_p = _round_up(OUT, 128)
    if OUT_p != OUT:
        w_bf = jnp.pad(w_bf, ((0, 0), (0, OUT_p - OUT)))
        b_p = jnp.pad(bias, (0, OUT_p - OUT))
    else:
        b_p = bias
    b_p = b_p.reshape(1, OUT_p).astype(jnp.float32)

    # Batch tiling (tm rows per grid step).  W/bias index_maps return (0,0) so
    # the weight stays resident in VMEM across all grid steps.
    tm = min(tm, _round_up(B, 8))
    B_p = _round_up(B, tm)
    if B_p != B:
        x_bf = jnp.pad(x_bf, ((0, B_p - B), (0, 0)))

    grid = (B_p // tm,)

    y_p = pl.pallas_call(
        _ttlinear_kernel,
        out_shape=jax.ShapeDtypeStruct((B_p, OUT_p), jnp.float32),
        grid_spec=pltpu.PrefetchScalarGridSpec(
            num_scalar_prefetch=0,
            grid=grid,
            in_specs=[
                pl.BlockSpec((tm, IN), lambda i: (i, 0)),       # streamed x
                pl.BlockSpec((IN, OUT_p), lambda i: (0, 0)),    # resident W
                pl.BlockSpec((1, OUT_p), lambda i: (0, 0)),     # resident bias
            ],
            out_specs=pl.BlockSpec((tm, OUT_p), lambda i: (i, 0)),
        ),
        compiler_params=pltpu.CompilerParams(
            dimension_semantics=("parallel",),       # shardable across v7x TCs
            vmem_limit_bytes=32 * 1024 * 1024,       # above v5e 16 MiB default
        ),
    )(x_bf, w_bf, b_p)

    return y_p[:B, :OUT]


# --------------------- TT parameter setup (plain JAX glue) -------------------

def tt_cores_to_dense_in_out(cores, out_modes, in_modes):
    """Materialize the TT-matrix (cores of shape (r_k, out_q[k], in_q[k], r_{k+1}))
    directly in (IN, OUT) layout, i.e. W.T — the layout the kernel consumes —
    so no standalone transpose / extra HBM pass is needed in the wrapper."""
    d = len(cores)
    full = cores[0]                                   # (1, i0, j0, r1)
    for c in cores[1:]:
        full = jnp.tensordot(full, c, axes=[[-1], [0]])
    # full: (1, i0, j0, i1, j1, ..., i_{d-1}, j_{d-1}, 1)
    full = jnp.squeeze(full, axis=(0, full.ndim - 1))
    # j-modes (input) first, i-modes (output) second  ->  reshape to (IN, OUT).
    perm = tuple(range(1, 2 * d, 2)) + tuple(range(0, 2 * d, 2))
    full = jnp.transpose(full, perm)
    IN = int(np.prod(in_modes))
    OUT = int(np.prod(out_modes))
    return full.reshape(IN, OUT)


# ---------------------------------- main -------------------------------------

if __name__ == "__main__":
    key = jax.random.PRNGKey(0)

    # Module config: in_features=64, out_features=64, d=3, tt_rank=8, bias=True.
    # t3.utils.auto_shape(64, d=3) -> [4, 4, 4] for both input and output modes.
    B = 256          # 2 grid steps of tm=128 -> pipelined + shardable on v7x
    d = 3
    tt_rank = 8
    in_q = (4, 4, 4)
    out_q = (4, 4, 4)
    IN = int(np.prod(in_q))     # 64
    OUT = int(np.prod(out_q))   # 64
    ranks = (1, tt_rank, tt_rank, 1)

    # Deterministic glorot-style TT core init (analogue of t3.glorot_initializer
    # followed by t3.transpose): core_k is (r_k, out_q[k], in_q[k], r_{k+1}).
    lamb = 2.0 / (IN + OUT)
    core_std = (lamb / float(np.prod(ranks))) ** (1.0 / d)
    keys = jax.random.split(key, d + 1)
    cores = []
    for k in range(d):
        shape = (ranks[k], out_q[k], in_q[k], ranks[k + 1])
        cores.append(core_std * jax.random.normal(keys[k], shape, dtype=jnp.float32))
    bias = 0.001 * jnp.ones((OUT,), dtype=jnp.float32)   # matches 0.001*torch.ones(out)

    # Materialize W.T (IN, OUT) directly from the TT cores (glue).
    w_io = tt_cores_to_dense_in_out(cores, out_q, in_q)

    # Example input (batch_size, input_dim).
    x = jax.random.normal(keys[d], (B, IN), dtype=jnp.float32)

    # Pallas kernel forward.
    y = tt_linear_forward(x, w_io, bias)
    y = jax.block_until_ready(y)
    assert y.shape == (B, OUT)

    # Reference 1: same bf16-rounded operands, f32 accumulation (tight check).
    x_q = x.astype(jnp.bfloat16).astype(jnp.float32)
    w_q = w_io.astype(jnp.bfloat16).astype(jnp.float32)
    y_ref_bf16 = x_q @ w_q + bias[None, :]
    assert np.allclose(np.asarray(y), np.asarray(y_ref_bf16), atol=1e-4, rtol=1e-3)

    # Reference 2: full-f32 module semantics (loose check for bf16 operands).
    y_ref_f32 = x @ w_io + bias[None, :]
    assert np.allclose(np.asarray(y), np.asarray(y_ref_f32), atol=2e-3, rtol=5e-2)

    print("KERNEL_OK")
</pallas_src>

<mosaic_0001>
module attributes {stable_mosaic.version = 11 : i64} {
  func.func @_ttlinear_kernel(%arg0: i32, %arg1: memref<128x64xbf16, #tpu.memory_space<vmem>>, %arg2: memref<64x128xbf16, #tpu.memory_space<vmem>>, %arg3: memref<1x128xf32, #tpu.memory_space<vmem>>, %arg4: memref<128x128xf32, #tpu.memory_space<vmem>>) attributes {dimension_semantics = [#tpu.dimension_semantics<parallel>], iteration_bounds = array<i64: 2>, scalar_prefetch = 0 : i64, scratch_operands = 0 : i64, tpu.core_type = #tpu.core_type<tc>, window_params = [{transform_indices = @transform_0, window_bounds = array<i64: 128, 64>}, {pipeline_mode = #tpu.pipeline_mode<synchronous>, transform_indices = @transform_1, window_bounds = array<i64: 64, 128>}, {pipeline_mode = #tpu.pipeline_mode<synchronous>, transform_indices = @transform_2, window_bounds = array<i64: 1, 128>}, {transform_indices = @transform_3, window_bounds = array<i64: 128, 128>}]} {
    %c0 = arith.constant 0 : index
    %c0_0 = arith.constant 0 : index
    %0 = vector.load %arg1[%c0, %c0_0] : memref<128x64xbf16, #tpu.memory_space<vmem>>, vector<128x64xbf16>
    %c0_1 = arith.constant 0 : index
    %c0_2 = arith.constant 0 : index
    %1 = vector.load %arg2[%c0_1, %c0_2] : memref<64x128xbf16, #tpu.memory_space<vmem>>, vector<64x128xbf16>
    %cst = arith.constant dense<0.000000e+00> : vector<128x128xf32>
    %2 = tpu.matmul %0, %1, %cst {dimension_numbers = #tpu.dot_dimension_numbers<[1], [0], [0], [1], [0, 0, 1, 1], [], []>} : vector<128x64xbf16>, vector<64x128xbf16>, vector<128x128xf32> -> vector<128x128xf32>
    %c0_3 = arith.constant 0 : index
    %c0_4 = arith.constant 0 : index
    %3 = vector.load %arg3[%c0_3, %c0_4] : memref<1x128xf32, #tpu.memory_space<vmem>>, vector<1x128xf32>
    %4 = vector.broadcast %3 : vector<1x128xf32> to vector<128x128xf32>
    %5 = arith.addf %2, %4 : vector<128x128xf32>
    %c0_5 = arith.constant 0 : index
    %c0_6 = arith.constant 0 : index
    %6 = vector.load %arg4[%c0_5, %c0_6] : memref<128x128xf32, #tpu.memory_space<vmem>>, vector<128x128xf32>
    tpu.vector_store %arg4[%c0_5, %c0_6], %5 {strides = array<i32>} : memref<128x128xf32, #tpu.memory_space<vmem>>, vector<128x128xf32>,
    return
  }
  func.func @transform_0(%arg0: i32) -> (i32, i32) {
    %c0_i32 = arith.constant 0 : i32
    %c0_i32_0 = arith.constant 0 : i32
    return %arg0, %c0_i32 : i32, i32
  }
  func.func @transform_1(%arg0: i32) -> (i32, i32) {
    %c0_i32 = arith.constant 0 : i32
    %c0_i32_0 = arith.constant 0 : i32
    %c0_i32_1 = arith.constant 0 : i32
    return %c0_i32, %c0_i32_0 : i32, i32
  }
  func.func @transform_2(%arg0: i32) -> (i32, i32) {
    %c0_i32 = arith.constant 0 : i32
    %c0_i32_0 = arith.constant 0 : i32
    %c0_i32_1 = arith.constant 0 : i32
    return %c0_i32, %c0_i32_0 : i32, i32
  }
  func.func @transform_3(%arg0: i32) -> (i32, i32) {
    %c0_i32 = arith.constant 0 : i32
    %c0_i32_0 = arith.constant 0 : i32
    return %arg0, %c0_i32 : i32, i32
  }
}

</mosaic_0001>

<bundles_post_ra>
// kernel: tpu_custom_call.1
= control target key start
LH: loop header
LB: loop body
LE: loop exit
PB: predicated region body
PF: predicated region fallthrough
CT: control target
= control target key end

     0   :  { %8 = vsyncpa [#allocation3], 0  ;;  %s845_s0 = inlined_call_operand.vmem [shape: bf16[256,64], index: 0, kind: input, shape index: {}]   ;;  %s846_s1 = inlined_call_operand.vmem [shape: bf16[64,128], index: 1, kind: input, shape index: {}]   ;;  %s847_s2 = inlined_call_operand.vmem [shape: f32[1,128], index: 2, kind: input, shape index: {}]   ;;  %s848_s3 = inlined_call_operand.hbm [shape: f32[256,128], index: 3, kind: output, shape index: {}]  }
   0x1   :  { %10 = vsyncpa [#allocation3 + $0x1], 0  ;;  %s698_s12 = smov 0   ;;  %s700_s13 = smov 0  }
   0x2   :  { %s702_s14 = smov 0   ;;  %s704_s15 = smov 0  }
   0x3 LB: > { %s719_s16 = sadd.s32 4294967295, %s673_s15   ;;  %s482_s17 = sadd.s32 4294967294, %s673_s15   ;;  %s673_s15 = sphi %s704_s15, %s854_s15   ;;  %s669_s14 = sphi %s702_s14, %s853_s14   ;;  %s665_s13 = sphi %s700_s13, %s852_s13   ;;  %s661_s12 = sphi %s698_s12, %s851_s12  }
   0x4   : > { %s723_s18 = sadd.s32 1, %s673_s15   ;;  %s91_s19 = sadd.s32 1, %s669_s14 }
   0x5   : > { %s88_s20 = ssub.s32 %s673_s15, %s723_s18  ;;  %p101_p0 = scmp.ne.s32.totalorder %s669_s14, %s665_s13 }
   0x6   : > { %p89_p1 = scmp.eq.s32.totalorder %s88_s20, 0  ;;  %p102_p2 = scmp.eq.s32.totalorder %s719_s16, 1 }
   0x7   : > { %p107_p3 = scmp.ne.s32.totalorder %s665_s13, %s661_s12  ;;  %p108_p4 = scmp.eq.s32.totalorder %s482_s17, 1 }
   0x8   : > { %s734_s21 = scalar_select %p89_p1, %s669_s14, %s91_s19  }
   0x9   : > { %p736_p5 = por %p102_p2, %p101_p0  ;;  %p740_p6 = por %p108_p4, %p107_p3 }
   0xa   : > { %p485_p7 = scmp.ge.s32.totalorder %s673_s15, 1  ;;  %p141_p8 = scmp.lt.s32.totalorder %s673_s15, 3 }
   0xc   : > { %p142_p9 = pnand %p485_p7, %p141_p8 }
   0xd   : > { %s487_s26 = sshll.u32 (!%p142_p9), %s719_s16, 4  ;;  %s162_s10 = sand.u32 (!%p142_p9), 1, %s665_s13  }
   0xe   : > { %145 = sbr.rel (%p142_p9) target bundleno = 259 (0x103), region = 32  ;;  %p166_p10 = scmp.lt.s32.totalorder (!%p142_p9), %s487_s26, 31 }
   0xf   : > { %s486_s11 = sshll.u32 (!%p142_p9), %s162_s10, 7  ;;  %s515_s24 = sshll.u32 (!%p142_p9), %s719_s16, 11 }
  0x10   : > { %s776_s20 = scalar_lea.vmem (!%p142_p9), [#allocation2], %s486_s11  ;;  %s795_s28 = scalar_lea.hbm (!%p142_p9), %s848_s3, %s515_s24 }
  0x11   : > { %s420_s25 = sshll.u32 (!%p142_p9), %s776_s20, 4  ;;  %s805_s16 = scalar_lea.sflag (!%p142_p9), [#allocation3], %s162_s10  ;;  %s797_s25 = int_to_ptr.vmem [resolvable:$true] %s420_s25 }
  0x12   : > { %s613_s29 = scalar_lea.vmem (!%p142_p9), %s797_s25, 2048  ;;  %s675_s30 = smov (!%p142_p9), [#allocation2]  }
  0x13   : > { %v601_v0 = vld [vmem:[%s846_s1 + $0x18] sm:$0xff]   ;;  %v602_v1 = vld [vmem:[%s846_s1 + $0x10] sm:$0xff]   ;;  %s856_s26 = smov (!%p166_p10, %s487_s26), 31  ;;  %v603_v2 = vld [vmem:[%s846_s1 + $0x8] sm:$0xff]   ;;  %vm268_vm0 = vcmask 523264   ;;  %p614_p11 = scmp.ne.s32.totalorder %s797_s25, %s613_s29 }
  0x14   : > { %528 = vmatprep.subr.bf16.mxu0 %v601_v0  ;;  %552 = vmatprep.subr.bf16.mxu1 %v601_v0  ;;  %s488_s4 = sshll.u32 %s856_s26, 2  ;;  %v604_v3 = vld [vmem:[%s846_s1] sm:$0xff]  }
  0x15   : > { %529 = vmatpush3.bf16.msra.mxu0 %v601_v0  ;;  %556 = vmatpush3.bf16.msra.mxu1 %v601_v0  ;;  %s169_s9 = scalar_lea.vmem %s845_s0, %s488_s4  ;;  %v489_v12 = vld [vmem:[%s847_s2] ss:$0 sm:$0xff]  ;;  %p615_p12 = pnand %p614_p11, %p736_p5 }
  0x16   : > { %530 = vmatprep.subr.bf16.mxu0 %v602_v1  ;;  %553 = vmatprep.subr.bf16.mxu1 %v602_v1  ;;  %v605_v4 = vld [vmem:[%s169_s9] sm:$0xff]   ;;  %v607_v6 = vld [vmem:[%s169_s9 + $0x8] sm:$0xff]   ;;  %v609_v8 = vld [vmem:[%s169_s9 + $0x10] sm:$0xff]   ;;  %s617_s4 = sshll.u32 %s675_s30, 4  ;;  %s618_s4 = int_to_ptr.vmem [resolvable:$false] %s617_s4 }
  0x17   : > { %v606_v5 = vld [vmem:[%s169_s9 + $0x20] sm:$0xff]   ;;  %536 = vmatprep.mubr.msk.bf16.mxu0 %vm268_vm0, %v605_v4  ;;  %v608_v7 = vld [vmem:[%s169_s9 + $0x28] sm:$0xff]   ;;  %v610_v9 = vld [vmem:[%s169_s9 + $0x30] sm:$0xff]   ;;  %p616_p13 = pneg %p615_p12  ;;  %s619_s5 = scalar_lea.vmem %s618_s4, 4096 }
  0x18   : > { %544 = vmatprep.mubr.msk.bf16.mxu1 %vm268_vm0, %v606_v5  ;;  %v611_v10 = vld [vmem:[%s169_s9 + $0x18] sm:$0xff]   ;;  %p620_p0 = scmp.lt.s32.totalorder %s797_s25, %s618_s4  ;;  %p621_p1 = scmp.lt.s32.totalorder %s619_s5, %s613_s29 }
  0x19   : > { %531 = vmatpush3.bf16.msra.mxu0 %v602_v1  ;;  %557 = vmatpush3.bf16.msra.mxu1 %v602_v1  ;;  %v612_v11 = vld [vmem:[%s169_s9 + $0x38] sm:$0xff]  }
  0x1a   : > { %532 = vmatprep.subr.bf16.mxu0 %v603_v2  ;;  %554 = vmatprep.subr.bf16.mxu1 %v603_v2  ;;  %p622_p2 = por %p621_p1, %p620_p0 }
  0x1c   : > { %p623_p3 = pnand %p622_p2, %p616_p13 }
  0x1d   : > { %533 = vmatpush3.bf16.msra.mxu0 %v603_v2  ;;  %558 = vmatpush3.bf16.msra.mxu1 %v603_v2 }
  0x1e   : > { %534 = vmatprep.subr.bf16.mxu0 %v604_v3  ;;  %555 = vmatprep.subr.bf16.mxu1 %v604_v3 }
  0x21   : > { %535 = vmatpush3.bf16.msra.mxu0 %v604_v3  ;;  %559 = vmatpush3.bf16.msra.mxu1 %v604_v3 }
  0x24   : > { %537 = vmatmul.mubr.msk.bf16.vlgmr.msra.gmra.mxu0 %vm268_vm0, %v607_v6  ;;  %545 = vmatmul.mubr.msk.bf16.vlgmr.msra.gmra.mxu1 %vm268_vm0, %v608_v7 }
  0x25   : > { %540 = vmatprep.mubr.msk.bf16.mxu0 %vm268_vm0, %v609_v8  ;;  %548 = vmatprep.mubr.msk.bf16.mxu1 %vm268_vm0, %v610_v9 }
  0x2c   : > { %541 = vmatmul.mubr.msk.bf16.gmra.mxu0 %vm268_vm0, %v611_v10  ;;  %549 = vmatmul.mubr.msk.bf16.gmra.mxu1 %vm268_vm0, %v612_v11 }
  0xe4   : > { %v538_v13 = vpop.f32.mrf.mxu0  ;;  %v546_v14 = vpop.f32.mrf.mxu1 }
  0xe5   : > { %v336_v15 = vadd.f32 %v538_v13, %v489_v12  ;;  %v368_v16 = vadd.f32 %v546_v14, %v489_v12 }
  0xe6   : > { %v327_v17 = vpop.f32.mrf.mxu0  ;;  %v359_v18 = vpop.f32.mrf.mxu1 }
  0xe7   : > { %392 = vst [vmem:[%s776_s20 + $0x10] sm:$0xff] %v336_v15  ;;  %400 = vst [vmem:[%s776_s20 + $0x50] sm:$0xff] %v368_v16  ;;  %v328_v19 = vadd.f32 %v489_v12, %v327_v17  ;;  %v360_v20 = vadd.f32 %v489_v12, %v359_v18 }
  0xe8   : > { %v539_v21 = vpop.f32.mrf.mxu0  ;;  %v547_v22 = vpop.f32.mrf.mxu1 }
  0xe9   : > { %390 = vst [vmem:[%s776_s20] sm:$0xff] %v328_v19  ;;  %398 = vst [vmem:[%s776_s20 + $0x40] sm:$0xff] %v360_v20  ;;  %v339_v23 = vadd.f32 %v539_v21, %v489_v12  ;;  %v371_v24 = vadd.f32 %v547_v22, %v489_v12 }
  0xea   : > { %v330_v25 = vpop.f32.mrf.mxu0  ;;  %v362_v26 = vpop.f32.mrf.mxu1 }
  0xeb   : > { %393 = vst [vmem:[%s776_s20 + $0x18] sm:$0xff] %v339_v23  ;;  %401 = vst [vmem:[%s776_s20 + $0x58] sm:$0xff] %v371_v24  ;;  %v331_v27 = vadd.f32 %v489_v12, %v330_v25  ;;  %v363_v28 = vadd.f32 %v489_v12, %v362_v26 }
  0xec   : > { %v542_v29 = vpop.f32.mrf.mxu0  ;;  %v550_v30 = vpop.f32.mrf.mxu1 }
  0xed   : > { %391 = vst [vmem:[%s776_s20 + $0x8] sm:$0xff] %v331_v27  ;;  %399 = vst [vmem:[%s776_s20 + $0x48] sm:$0xff] %v363_v28  ;;  %v352_v31 = vadd.f32 %v542_v29, %v489_v12  ;;  %v384_v32 = vadd.f32 %v550_v30, %v489_v12 }
  0xee   : > { %v343_v33 = vpop.f32.mrf.mxu0  ;;  %v375_v34 = vpop.f32.mrf.mxu1 }
  0xef   : > { %396 = vst [vmem:[%s776_s20 + $0x30] sm:$0xff] %v352_v31  ;;  %404 = vst [vmem:[%s776_s20 + $0x70] sm:$0xff] %v384_v32  ;;  %v344_v35 = vadd.f32 %v489_v12, %v343_v33  ;;  %v376_v36 = vadd.f32 %v489_v12, %v375_v34 }
  0xf0   : > { %v543_v37 = vpop.f32.mrf.mxu0  ;;  %v551_v38 = vpop.f32.mrf.mxu1 }
  0xf1   : > { %394 = vst [vmem:[%s776_s20 + $0x20] sm:$0xff] %v344_v35  ;;  %402 = vst [vmem:[%s776_s20 + $0x60] sm:$0xff] %v376_v36  ;;  %v355_v39 = vadd.f32 %v543_v37, %v489_v12  ;;  %v387_v40 = vadd.f32 %v551_v38, %v489_v12 }
  0xf2   : > { %v346_v41 = vpop.f32.mrf.mxu0  ;;  %v378_v42 = vpop.f32.mrf.mxu1 }
  0xf3   : > { %397 = vst [vmem:[%s776_s20 + $0x38] sm:$0xff] %v355_v39  ;;  %405 = vst [vmem:[%s776_s20 + $0x78] sm:$0xff] %v387_v40  ;;  %v347_v43 = vadd.f32 %v489_v12, %v346_v41  ;;  %v379_v44 = vadd.f32 %v489_v12, %v378_v42 }
  0xf5   : > { %395 = vst [vmem:[%s776_s20 + $0x28] sm:$0xff] %v347_v43  ;;  %403 = vst [vmem:[%s776_s20 + $0x68] sm:$0xff] %v379_v44 }
  0xf6   : > { %626 = shalt.err (!%p623_p3)
}
  0xf7   : > { %s627_s6 = scalar_lea.hbm %s795_s28, 2048  ;;  %s631_s9 = scalar_lea.hbm %s848_s3, 4096 }
  0xf8   : > { %p628_p4 = scmp.ne.s32.totalorder %s795_s28, %s627_s6  ;;  %p632_p9 = scmp.lt.s32.totalorder %s795_s28, %s848_s3 }
  0xf9   : > { %p633_p10 = scmp.lt.s32.totalorder %s631_s9, %s627_s6 }
  0xfa   : > { %p629_p7 = pnand %p628_p4, %p736_p5 }
  0xfb   : > { %p634_p11 = por %p633_p10, %p632_p9 }
  0xfc   : > { %p630_p8 = pneg %p629_p7 }
  0xfe   : > { %p635_p12 = pnand %p634_p11, %p630_p8 }
 0x100   : > { %638 = shalt.err (!%p635_p12)
}
 0x101   : > { %s676_s17 = smov 128   ;;  %s677_s19 = smov 8  }
 0x102   : > { %560 = dma.vmem_to_hbm [thread:$0]  (%p736_p5), %s797_s25, 2048, %s795_s28, %s805_s16, %s676_s17, %s676_s17, %s677_s19  }
 0x103 PF: > { %p566_p13 = scmp.ge.s32.totalorder %s673_s15, 2  ;;  %s435_s20 = sand.u32 1, %s661_s12  }
 0x104   : > { %s436_s24 = scalar_lea.sflag [#allocation3], %s435_s20 }
 0x105   : > { %p563_p0 = pnand %p566_p13, %p740_p6 }
 0x107   : > { %p564_p1 = pneg %p563_p0 }
 0x109   : > { %656 = dma.done.wait (%p564_p1), %s436_s24, 2048  }
 0x10a   : > { %658 = vsyncadd (%p564_p1), %s436_s24, 4294965248  ;;  %p13_p2 = scmp.ge.s32.totalorder %s723_s18, 4   ;;  %s851_s12 = smov %s665_s13 }
 0x10b   : > { %s852_s13 = smov %s669_s14  ;;  %s853_s14 = smov %s734_s21 }
 0x10c   : > { %s854_s15 = smov %s723_s18  ;;  %15 = sbr.rel (!%p13_p2) target bundleno = 3 (0x3), region = 67 }
 0x111   :  { %441 = vsyncpa [#allocation3], 1 }
 0x112   :  { %443 = vsyncpa [#allocation3 + $0x1], 1 }

</bundles_post_ra>
